<compile_context>
chip_gen: v7x
topology: tpu7x:2x2x1
jax: 0.10.0
libtpu: 0.0.40
codegen_flags: <defaults>
</compile_context>

<pallas_src>
import functools

import jax
import jax.numpy as jnp
from jax.experimental import pallas as pl
from jax.experimental.pallas import tpu as pltpu


def _round_up(n, m):
    return ((n + m - 1) // m) * m


# ----------------------------- Pallas kernel ---------------------------------

def _fused_bilstm_step(x, w, b, gp):
    """Both directions of one LSTM layer, single time step, zero state.

    x: (TB, K)     matmul dtype (f32 or bf16)
    w: (K, 3*gp)   columns [i_f,i_b,0.. | o_f,o_b,0.. | g_f,g_b,0..]
    b: (1, 3*gp)   f32, b_ih + b_hh folded (exact: T == 1, h0 == 0)
    Returns h: (TB, gp) f32 with h[:, 2H:] == 0 exactly, i.e. already the
    zero-padded K operand for the next matmul.
    """
    gates = jnp.dot(x, w, preferred_element_type=jnp.float32) + b      # (TB, 3*gp) f32
    i = jax.nn.sigmoid(gates[:, 0 * gp:1 * gp])      # each slice 128-lane aligned
    o = jax.nn.sigmoid(gates[:, 1 * gp:2 * gp])
    g = jnp.tanh(gates[:, 2 * gp:3 * gp])
    c = i * g                          # forget * c_prev == 0 dropped (exact, c0 == 0)
    return o * jnp.tanh(c)             # pad lanes: 0.5 * tanh(0.5 * 0) == 0 exactly


def bilstm_kernel(x_ref,
                  w0_ref, b0_ref,
                  w1_ref, b1_ref,
                  wfc_ref, bfc_ref,
                  out_ref, *, gp):
    x = x_ref[...]                                                     # (TB, D_pad)

    # ---- LSTM layer 0 (both directions fused into one MXU matmul) ----
    h = _fused_bilstm_step(x, w0_ref[...], b0_ref[...], gp)           # (TB, gp) f32

    # TODO(synk): inter-layer LSTM dropout and nn.Dropout are identity at inference; not modeled.

    # ---- LSTM layer 1 (both directions fused) ----
    h = _fused_bilstm_step(h.astype(w1_ref.dtype), w1_ref[...], b1_ref[...], gp)

    # ---- fc1 + softmax(dim=1), lane-dense padded output ----
    # Padded columns: weight 0, bias -1e30 (kept f32) -> exp == 0 -> exact softmax.
    logits = jnp.dot(h.astype(wfc_ref.dtype), wfc_ref[...],
                     preferred_element_type=jnp.float32) + bfc_ref[...]   # (TB, OUT_PAD)
    z = logits - jnp.max(logits, axis=1, keepdims=True)
    e = jnp.exp(z)
    s = jnp.sum(e, axis=1, keepdims=True)
    inv = pl.reciprocal(s, approx=True)        # EUP slot
    inv = inv * (2.0 - s * inv)                # one Newton step -> full f32 precision
    out_ref[...] = e * inv


# ------------------------------- Wrapper --------------------------------------

def bilstm_forward(x, packed, hidden_size, num_classes, *, tile_batch=None):
    """Inference forward of the BiLSTM module.

    NOTE: valid only for the module's forward as written: seq_len == 1
    (x.unsqueeze(1)) and zero initial (h0, c0). Do NOT reuse for T > 1 or
    nonzero initial state (the W_hh term and forget gate were eliminated
    exactly under those assumptions).
    """
    B, D = x.shape
    gp, d_pad, out_pad = packed["gp"], packed["d_pad"], packed["out_pad"]
    assert D <= d_pad
    mm_dtype = packed["w0"].dtype

    # Large batch tiles amortize the ~0.35 us per-grid-step overhead; multiple of 8
    # (f32 sublane). Footprint ~130 KB resident weights + 2 * TB * (d_pad + out_pad) * 4 B,
    # so even TB = 1024 fits every generation's scoped-VMEM default with headroom.
    if tile_batch is None:
        tile_batch = min(1024, _round_up(B, 8))
    tb = _round_up(tile_batch, 8)
    b_pad = _round_up(max(B, tb), tb)

    # Pad batch rows and feature lanes with zeros (matching weight rows are zero).
    x_pad = jnp.zeros((b_pad, d_pad), mm_dtype).at[:B, :D].set(x.astype(mm_dtype))

    out_padded = pl.pallas_call(
        functools.partial(bilstm_kernel, gp=gp),
        out_shape=jax.ShapeDtypeStruct((b_pad, out_pad), jnp.float32),
        grid_spec=pltpu.PrefetchScalarGridSpec(
            num_scalar_prefetch=0,
            grid=(b_pad // tb,),
            in_specs=[
                # x: batch-tiled, double-buffered by the pipeline.
                # (pipeline_mode=pl.Buffered(3) only if xprof shows exposed DMA.)
                pl.BlockSpec((tb, d_pad), lambda i: (i, 0)),
                # weights / biases: constant index_map -> fetched once, VMEM-resident.
                pl.BlockSpec((d_pad, 3 * gp), lambda i: (0, 0)),
                pl.BlockSpec((1, 3 * gp), lambda i: (0, 0)),
                pl.BlockSpec((gp, 3 * gp), lambda i: (0, 0)),
                pl.BlockSpec((1, 3 * gp), lambda i: (0, 0)),
                pl.BlockSpec((gp, out_pad), lambda i: (0, 0)),
                pl.BlockSpec((1, out_pad), lambda i: (0, 0)),
            ],
            out_specs=pl.BlockSpec((tb, out_pad), lambda i: (i, 0)),
        ),
        # Batch axis is embarrassingly parallel -> sharded across both TCs on v7x.
        compiler_params=pltpu.CompilerParams(dimension_semantics=("parallel",)),
    )(x_pad,
      packed["w0"], packed["b0"],
      packed["w1"], packed["b1"],
      packed["w_fc"], packed["b_fc"])

    # TODO(synk): if the consumer accepts the lane-dense (b_pad, 128) softmax tile,
    # drop this slice and keep the padded tile end-to-end.
    return out_padded[:B, :num_classes]


# --------------------------- Parameter init / packing -------------------------

def init_raw_params(key, input_dim, H, C):
    """PyTorch-style uniform(-1/sqrt(H), 1/sqrt(H)) init for all LSTM/fc params."""
    k_lstm = 1.0 / float(H) ** 0.5
    keys = jax.random.split(key, 18)

    def u(kk, shape, bound):
        return jax.random.uniform(kk, shape, jnp.float32, -bound, bound)

    def lstm_dir(k0, k1, k2, k3, in_dim):
        return dict(w_ih=u(k0, (4 * H, in_dim), k_lstm),
                    w_hh=u(k1, (4 * H, H), k_lstm),
                    b_ih=u(k2, (4 * H,), k_lstm),
                    b_hh=u(k3, (4 * H,), k_lstm))

    l0_f = lstm_dir(keys[0], keys[1], keys[2], keys[3], input_dim)
    l0_b = lstm_dir(keys[4], keys[5], keys[6], keys[7], input_dim)
    l1_f = lstm_dir(keys[8], keys[9], keys[10], keys[11], 2 * H)
    l1_b = lstm_dir(keys[12], keys[13], keys[14], keys[15], 2 * H)

    k_fc = 1.0 / float(2 * H) ** 0.5
    w_fc = u(keys[16], (C, 2 * H), k_fc)
    b_fc = u(keys[17], (C,), k_fc)
    return dict(l0_f=l0_f, l0_b=l0_b, l1_f=l1_f, l1_b=l1_b, w_fc=w_fc, b_fc=b_fc)


def pack_params(raw, input_dim, H, C, matmul_dtype=jnp.float32):
    """Pack PyTorch-style params into the fused, padded, pre-transposed layout.

    matmul_dtype: dtype of the dot operands (weights + activations). Use
    jnp.bfloat16 on v6e/v7x for ~2x MXU throughput and half the DMA bytes;
    biases / f32 accumulation / all elementwise stay f32 (v5e has no bf16
    VPU/EUP, and the -1e30 pad bias must stay finite).
    """
    gp = _round_up(2 * H, 128)          # per-gate-group padded width
    d_pad = _round_up(input_dim, 128)   # padded input feature dim (K of layer 0)
    out_pad = _round_up(C, 128)         # lane-dense padded output width

    def pack_layer(fwd, bwd, in_dim, in_pad):
        # Fold biases (exact: T == 1, h0 == 0). PyTorch gate rows are [i, f, g, o];
        # the forget gate is dropped (exact: c0 == 0).
        w_f, b_f = fwd["w_ih"], fwd["b_ih"] + fwd["b_hh"]
        w_b, b_b = bwd["w_ih"], bwd["b_ih"] + bwd["b_hh"]

        def gate(w, b, r):
            return w[r * H:(r + 1) * H].T, b[r * H:(r + 1) * H]

        W = jnp.zeros((in_pad, 3 * gp), jnp.float32)
        Bv = jnp.zeros((1, 3 * gp), jnp.float32)
        # Column groups [i | o | g], each gp wide, forward then backward, zero-padded.
        for grp, r in enumerate((0, 3, 2)):
            wf, bf = gate(w_f, b_f, r)
            wb, bb = gate(w_b, b_b, r)
            off = grp * gp
            W = W.at[:in_dim, off:off + H].set(wf)
            W = W.at[:in_dim, off + H:off + 2 * H].set(wb)
            Bv = Bv.at[0, off:off + H].set(bf)
            Bv = Bv.at[0, off + H:off + 2 * H].set(bb)
        return W.astype(matmul_dtype), Bv                    # bias stays f32

    w0, b0 = pack_layer(raw["l0_f"], raw["l0_b"], input_dim, d_pad)
    w1, b1 = pack_layer(raw["l1_f"], raw["l1_b"], 2 * H, gp)

    # fc1: pre-transposed (gp, out_pad); padded columns -> weight 0, bias -1e30 (f32 only!).
    w_fc = jnp.zeros((gp, out_pad), jnp.float32).at[:2 * H, :C].set(raw["w_fc"].T)
    b_fc = jnp.full((1, out_pad), -1e30, jnp.float32).at[0, :C].set(raw["b_fc"])
    return dict(w0=w0, b0=b0, w1=w1, b1=b1,
                w_fc=w_fc.astype(matmul_dtype), b_fc=b_fc,
                gp=gp, d_pad=d_pad, out_pad=out_pad)


# ------------------------ Pure-JAX reference (check) ---------------------------

def reference_forward(x, raw, H):
    """Full PyTorch LSTM-cell math (including W_hh and forget gate) with zero state."""

    def cell(xx, p):
        B = xx.shape[0]
        h0 = jnp.zeros((B, H), jnp.float32)
        c0 = jnp.zeros((B, H), jnp.float32)
        g = xx @ p["w_ih"].T + h0 @ p["w_hh"].T + p["b_ih"] + p["b_hh"]
        i = jax.nn.sigmoid(g[:, 0 * H:1 * H])
        f = jax.nn.sigmoid(g[:, 1 * H:2 * H])
        gg = jnp.tanh(g[:, 2 * H:3 * H])
        o = jax.nn.sigmoid(g[:, 3 * H:4 * H])
        c = f * c0 + i * gg
        return o * jnp.tanh(c)

    h = jnp.concatenate([cell(x, raw["l0_f"]), cell(x, raw["l0_b"])], axis=-1)
    h = jnp.concatenate([cell(h, raw["l1_f"]), cell(h, raw["l1_b"])], axis=-1)
    logits = h @ raw["w_fc"].T + raw["b_fc"]
    return jax.nn.softmax(logits, axis=1)


# ---------------------------------- Main ---------------------------------------

if __name__ == "__main__":
    B, D, H, C = 16, 64, 32, 3        # batch, input features, hidden_size, num_classes

    key = jax.random.PRNGKey(0)
    k_x, k_p = jax.random.split(key)
    x = jax.random.normal(k_x, (B, D), jnp.float32)

    raw = init_raw_params(k_p, D, H, C)
    ref = reference_forward(x, raw, H)

    # f32 matmul operands (exact vs reference); tile_batch=8 -> 2-step batch grid
    # exercising the pipelined grid + VMEM-resident weights.
    packed = pack_params(raw, D, H, C, matmul_dtype=jnp.float32)
    out = jax.block_until_ready(bilstm_forward(x, packed, H, C, tile_batch=8))
    assert out.shape == (B, C)
    assert jnp.allclose(out, ref, atol=1e-5, rtol=1e-5), "f32 mismatch vs reference"
    assert jnp.allclose(jnp.sum(out, axis=1), jnp.ones((B,)), atol=1e-5)

    # bf16 matmul operands (v6e/v7x fast path); f32 accumulation/bias/elementwise,
    # compared against the f32 reference with a loosened tolerance.
    packed_bf16 = pack_params(raw, D, H, C, matmul_dtype=jnp.bfloat16)
    out_bf16 = jax.block_until_ready(bilstm_forward(x, packed_bf16, H, C, tile_batch=8))
    assert out_bf16.shape == (B, C)
    assert jnp.allclose(out_bf16, ref, atol=3e-2), "bf16 mismatch vs reference"

    print("KERNEL_OK")
</pallas_src>

<mosaic_0001>
module attributes {stable_mosaic.version = 11 : i64} {
  func.func @bilstm_kernel(%arg0: i32, %arg1: memref<8x128xf32, #tpu.memory_space<vmem>>, %arg2: memref<128x384xf32, #tpu.memory_space<vmem>>, %arg3: memref<1x384xf32, #tpu.memory_space<vmem>>, %arg4: memref<128x384xf32, #tpu.memory_space<vmem>>, %arg5: memref<1x384xf32, #tpu.memory_space<vmem>>, %arg6: memref<128x128xf32, #tpu.memory_space<vmem>>, %arg7: memref<1x128xf32, #tpu.memory_space<vmem>>, %arg8: memref<8x128xf32, #tpu.memory_space<vmem>>) attributes {dimension_semantics = [#tpu.dimension_semantics<parallel>], iteration_bounds = array<i64: 2>, scalar_prefetch = 0 : i64, scratch_operands = 0 : i64, tpu.core_type = #tpu.core_type<tc>, window_params = [{transform_indices = @transform_0, window_bounds = array<i64: 8, 128>}, {pipeline_mode = #tpu.pipeline_mode<synchronous>, transform_indices = @transform_1, window_bounds = array<i64: 128, 384>}, {pipeline_mode = #tpu.pipeline_mode<synchronous>, transform_indices = @transform_2, window_bounds = array<i64: 1, 384>}, {pipeline_mode = #tpu.pipeline_mode<synchronous>, transform_indices = @transform_3, window_bounds = array<i64: 128, 384>}, {pipeline_mode = #tpu.pipeline_mode<synchronous>, transform_indices = @transform_4, window_bounds = array<i64: 1, 384>}, {pipeline_mode = #tpu.pipeline_mode<synchronous>, transform_indices = @transform_5, window_bounds = array<i64: 128, 128>}, {pipeline_mode = #tpu.pipeline_mode<synchronous>, transform_indices = @transform_6, window_bounds = array<i64: 1, 128>}, {transform_indices = @transform_7, window_bounds = array<i64: 8, 128>}]} {
    %c0 = arith.constant 0 : index
    %c0_0 = arith.constant 0 : index
    %0 = vector.load %arg1[%c0, %c0_0] : memref<8x128xf32, #tpu.memory_space<vmem>>, vector<8x128xf32>
    %c0_1 = arith.constant 0 : index
    %c0_2 = arith.constant 0 : index
    %1 = vector.load %arg2[%c0_1, %c0_2] : memref<128x384xf32, #tpu.memory_space<vmem>>, vector<128x384xf32>
    %c0_3 = arith.constant 0 : index
    %c0_4 = arith.constant 0 : index
    %2 = vector.load %arg3[%c0_3, %c0_4] : memref<1x384xf32, #tpu.memory_space<vmem>>, vector<1x384xf32>
    %cst = arith.constant dense<0.000000e+00> : vector<8x384xf32>
    %3 = tpu.matmul %0, %1, %cst {dimension_numbers = #tpu.dot_dimension_numbers<[1], [0], [0], [1], [0, 0, 1, 1], [], []>} : vector<8x128xf32>, vector<128x384xf32>, vector<8x384xf32> -> vector<8x384xf32>
    %4 = vector.broadcast %2 : vector<1x384xf32> to vector<8x384xf32>
    %5 = arith.addf %3, %4 : vector<8x384xf32>
    %6 = vector.extract_strided_slice %5 {offsets = [0, 0], sizes = [8, 128], strides = [1, 1]} : vector<8x384xf32> to vector<8x128xf32>
    %7 = arith.negf %6 : vector<8x128xf32>
    %8 = math.exp %7 : vector<8x128xf32>
    %cst_5 = arith.constant 1.000000e+00 : f32
    %9 = vector.broadcast %cst_5 : f32 to vector<8x128xf32>
    %10 = arith.addf %9, %8 : vector<8x128xf32>
    %11 = arith.divf %9, %10 : vector<8x128xf32>
    %12 = vector.extract_strided_slice %5 {offsets = [0, 128], sizes = [8, 128], strides = [1, 1]} : vector<8x384xf32> to vector<8x128xf32>
    %13 = arith.negf %12 : vector<8x128xf32>
    %14 = math.exp %13 : vector<8x128xf32>
    %cst_6 = arith.constant 1.000000e+00 : f32
    %15 = vector.broadcast %cst_6 : f32 to vector<8x128xf32>
    %16 = arith.addf %15, %14 : vector<8x128xf32>
    %17 = arith.divf %15, %16 : vector<8x128xf32>
    %18 = vector.extract_strided_slice %5 {offsets = [0, 256], sizes = [8, 128], strides = [1, 1]} : vector<8x384xf32> to vector<8x128xf32>
    %19 = math.tanh %18 : vector<8x128xf32>
    %20 = arith.mulf %11, %19 : vector<8x128xf32>
    %21 = math.tanh %20 : vector<8x128xf32>
    %22 = arith.mulf %17, %21 : vector<8x128xf32>
    %c0_7 = arith.constant 0 : index
    %c0_8 = arith.constant 0 : index
    %23 = vector.load %arg4[%c0_7, %c0_8] : memref<128x384xf32, #tpu.memory_space<vmem>>, vector<128x384xf32>
    %c0_9 = arith.constant 0 : index
    %c0_10 = arith.constant 0 : index
    %24 = vector.load %arg5[%c0_9, %c0_10] : memref<1x384xf32, #tpu.memory_space<vmem>>, vector<1x384xf32>
    %cst_11 = arith.constant dense<0.000000e+00> : vector<8x384xf32>
    %25 = tpu.matmul %22, %23, %cst_11 {dimension_numbers = #tpu.dot_dimension_numbers<[1], [0], [0], [1], [0, 0, 1, 1], [], []>} : vector<8x128xf32>, vector<128x384xf32>, vector<8x384xf32> -> vector<8x384xf32>
    %26 = vector.broadcast %24 : vector<1x384xf32> to vector<8x384xf32>
    %27 = arith.addf %25, %26 : vector<8x384xf32>
    %28 = vector.extract_strided_slice %27 {offsets = [0, 0], sizes = [8, 128], strides = [1, 1]} : vector<8x384xf32> to vector<8x128xf32>
    %29 = arith.negf %28 : vector<8x128xf32>
    %30 = math.exp %29 : vector<8x128xf32>
    %cst_12 = arith.constant 1.000000e+00 : f32
    %31 = vector.broadcast %cst_12 : f32 to vector<8x128xf32>
    %32 = arith.addf %31, %30 : vector<8x128xf32>
    %33 = arith.divf %31, %32 : vector<8x128xf32>
    %34 = vector.extract_strided_slice %27 {offsets = [0, 128], sizes = [8, 128], strides = [1, 1]} : vector<8x384xf32> to vector<8x128xf32>
    %35 = arith.negf %34 : vector<8x128xf32>
    %36 = math.exp %35 : vector<8x128xf32>
    %cst_13 = arith.constant 1.000000e+00 : f32
    %37 = vector.broadcast %cst_13 : f32 to vector<8x128xf32>
    %38 = arith.addf %37, %36 : vector<8x128xf32>
    %39 = arith.divf %37, %38 : vector<8x128xf32>
    %40 = vector.extract_strided_slice %27 {offsets = [0, 256], sizes = [8, 128], strides = [1, 1]} : vector<8x384xf32> to vector<8x128xf32>
    %41 = math.tanh %40 : vector<8x128xf32>
    %42 = arith.mulf %33, %41 : vector<8x128xf32>
    %43 = math.tanh %42 : vector<8x128xf32>
    %44 = arith.mulf %39, %43 : vector<8x128xf32>
    %c0_14 = arith.constant 0 : index
    %c0_15 = arith.constant 0 : index
    %45 = vector.load %arg6[%c0_14, %c0_15] : memref<128x128xf32, #tpu.memory_space<vmem>>, vector<128x128xf32>
    %cst_16 = arith.constant dense<0.000000e+00> : vector<8x128xf32>
    %46 = tpu.matmul %44, %45, %cst_16 {dimension_numbers = #tpu.dot_dimension_numbers<[1], [0], [0], [1], [0, 0, 1, 1], [], []>} : vector<8x128xf32>, vector<128x128xf32>, vector<8x128xf32> -> vector<8x128xf32>
    %c0_17 = arith.constant 0 : index
    %c0_18 = arith.constant 0 : index
    %47 = vector.load %arg7[%c0_17, %c0_18] : memref<1x128xf32, #tpu.memory_space<vmem>>, vector<1x128xf32>
    %48 = vector.broadcast %47 : vector<1x128xf32> to vector<8x128xf32>
    %49 = arith.addf %46, %48 : vector<8x128xf32>
    %cst_19 = arith.constant dense<0xFF800000> : vector<8xf32>
    %50 = vector.multi_reduction <maximumf>, %49, %cst_19 [1] : vector<8x128xf32> to vector<8xf32>
    %51 = vector.shape_cast %50 : vector<8xf32> to vector<8x1xf32>
    %52 = vector.broadcast %51 : vector<8x1xf32> to vector<8x128xf32>
    %53 = arith.subf %49, %52 : vector<8x128xf32>
    %54 = math.exp %53 : vector<8x128xf32>
    %cst_20 = arith.constant dense<0.000000e+00> : vector<8xf32>
    %55 = vector.multi_reduction <add>, %54, %cst_20 [1] : vector<8x128xf32> to vector<8xf32>
    %56 = vector.shape_cast %55 : vector<8xf32> to vector<8x1xf32>
    %57 = tpu.reciprocal %56 {approx = true} : vector<8x1xf32> -> vector<8x1xf32>
    %58 = arith.mulf %56, %57 : vector<8x1xf32>
    %cst_21 = arith.constant 2.000000e+00 : f32
    %59 = vector.broadcast %cst_21 : f32 to vector<8x1xf32>
    %60 = arith.subf %59, %58 : vector<8x1xf32>
    %61 = arith.mulf %57, %60 : vector<8x1xf32>
    %62 = vector.broadcast %61 : vector<8x1xf32> to vector<8x128xf32>
    %63 = arith.mulf %54, %62 : vector<8x128xf32>
    %c0_22 = arith.constant 0 : index
    %c0_23 = arith.constant 0 : index
    %64 = vector.load %arg8[%c0_22, %c0_23] : memref<8x128xf32, #tpu.memory_space<vmem>>, vector<8x128xf32>
    tpu.vector_store %arg8[%c0_22, %c0_23], %63 {strides = array<i32>} : memref<8x128xf32, #tpu.memory_space<vmem>>, vector<8x128xf32>,
    return
  }
  func.func @transform_0(%arg0: i32) -> (i32, i32) {
    %c0_i32 = arith.constant 0 : i32
    %c0_i32_0 = arith.constant 0 : i32
    return %arg0, %c0_i32 : i32, i32
  }
  func.func @transform_1(%arg0: i32) -> (i32, i32) {
    %c0_i32 = arith.constant 0 : i32
    %c0_i32_0 = arith.constant 0 : i32
    %c0_i32_1 = arith.constant 0 : i32
    return %c0_i32, %c0_i32_0 : i32, i32
  }
  func.func @transform_2(%arg0: i32) -> (i32, i32) {
    %c0_i32 = arith.constant 0 : i32
    %c0_i32_0 = arith.constant 0 : i32
    %c0_i32_1 = arith.constant 0 : i32
    return %c0_i32, %c0_i32_0 : i32, i32
  }
  func.func @transform_3(%arg0: i32) -> (i32, i32) {
    %c0_i32 = arith.constant 0 : i32
    %c0_i32_0 = arith.constant 0 : i32
    %c0_i32_1 = arith.constant 0 : i32
    return %c0_i32, %c0_i32_0 : i32, i32
  }
  func.func @transform_4(%arg0: i32) -> (i32, i32) {
    %c0_i32 = arith.constant 0 : i32
    %c0_i32_0 = arith.constant 0 : i32
    %c0_i32_1 = arith.constant 0 : i32
    return %c0_i32, %c0_i32_0 : i32, i32
  }
  func.func @transform_5(%arg0: i32) -> (i32, i32) {
    %c0_i32 = arith.constant 0 : i32
    %c0_i32_0 = arith.constant 0 : i32
    %c0_i32_1 = arith.constant 0 : i32
    return %c0_i32, %c0_i32_0 : i32, i32
  }
  func.func @transform_6(%arg0: i32) -> (i32, i32) {
    %c0_i32 = arith.constant 0 : i32
    %c0_i32_0 = arith.constant 0 : i32
    %c0_i32_1 = arith.constant 0 : i32
    return %c0_i32, %c0_i32_0 : i32, i32
  }
  func.func @transform_7(%arg0: i32) -> (i32, i32) {
    %c0_i32 = arith.constant 0 : i32
    %c0_i32_0 = arith.constant 0 : i32
    return %arg0, %c0_i32 : i32, i32
  }
}

</mosaic_0001>

<bundles_post_ra>
// kernel: tpu_custom_call.1
= control target key start
LH: loop header
LB: loop body
LE: loop exit
PB: predicated region body
PF: predicated region fallthrough
CT: control target
= control target key end

     0   :  { %12 = vsyncpa [#allocation3], 0  ;;  %s1990_s0 = inlined_call_operand.hbm [shape: f32[16,128], index: 0, kind: input, shape index: {}]   ;;  %s1991_s1 = inlined_call_operand.hbm [shape: f32[128,384], index: 1, kind: input, shape index: {}]   ;;  %s1992_s2 = inlined_call_operand.vmem [shape: f32[1,384], index: 2, kind: input, shape index: {}]   ;;  %s1993_s3 = inlined_call_operand.hbm [shape: f32[128,384], index: 3, kind: input, shape index: {}]   ;;  %s1994_s4 = inlined_call_operand.vmem [shape: f32[1,384], index: 4, kind: input, shape index: {}]   ;;  %s1995_s5 = inlined_call_operand.hbm [shape: f32[128,128], index: 5, kind: input, shape index: {}]   ;;  %s1996_s6 = inlined_call_operand.vmem [shape: f32[1,128], index: 6, kind: input, shape index: {}]   ;;  %s1997_s7 = inlined_call_operand.hbm [shape: f32[16,128], index: 7, kind: output, shape index: {}]  }
   0x1   :  { %14 = vsyncpa [#allocation3 + $0x1], 0 }
   0x2   :  { %15 = vsyncpa [#allocation6], 0 }
   0x3   :  { %16 = vsyncpa [#allocation9], 0 }
   0x4   :  { %17 = vsyncpa [#allocation4], 0 }
   0x5   :  { %19 = vsyncpa [#allocation4 + $0x1], 0  ;;  %s1671_s24 = smov 0   ;;  %s1673_s25 = smov 0  }
   0x6   :  { %s1675_s26 = smov 0   ;;  %s1677_s27 = smov 0  }
   0x7 LB: > { %s1692_s28 = sadd.s32 4294967295, %s1617_s27   ;;  %s1002_s29 = sadd.s32 4294967294, %s1617_s27   ;;  %s1617_s27 = sphi %s1677_s27, %s2023_s27   ;;  %s1613_s26 = sphi %s1675_s26, %s2022_s26   ;;  %s1609_s25 = sphi %s1673_s25, %s2021_s25   ;;  %s1605_s24 = sphi %s1671_s24, %s2020_s24  }
   0x8   : > { %p45_p0 = scmp.ne.s32.totalorder %s1609_s25, %s1605_s24  ;;  %p1998_p1 = scmp.eq.s32.totalorder %s1692_s28, 0 }
   0x9   : > { %p201_p3 = scmp.eq.s32.totalorder %s1002_s29, 1  ;;  %p1003_p5 = scmp.ge.s32.totalorder %s1617_s27, 1 }
   0xa   : > { %p1701_p4 = por %p1998_p1, %p45_p0  ;;  %p208_p7 = scmp.lt.s32.totalorder %s1617_s27, 3 }
   0xb   : > { %p1706_p6 = por %p201_p3, %p45_p0  ;;  %s1619_s10 = smov [#allocation5]  }
   0xc   : > { %s2002_s30 = scalar_select %p1701_p4, 1, 0 }
   0xd   : > { %s2003_s8 = scalar_select %p1706_p6, 1, 0 }
   0xe   : > { %p1711_p8 = pnand %p1003_p5, %p208_p7  ;;  %s220_s11 = sshll.u32 %s1619_s10, 4  ;;  %s1715_s11 = int_to_ptr.vmem [resolvable:$true] %s220_s11 }
   0xf   : > { %2004 = sst [smem:[#allocation15_spill]] %s2003_s8  ;;  %s1620_s13 = smov [#allocation7]  }
  0x10   : > { %s2005_s9 = scalar_select %p1711_p8, 1, 0 }
  0x11   : > { %p1333_p9 = pneg %p1711_p8  ;;  %s236_s14 = sshll.u32 %s1620_s13, 4  ;;  %s1726_s14 = int_to_ptr.vmem [resolvable:$true] %s236_s14 }
  0x12   : > { %s1621_s15 = smov [#allocation8]   ;;  %s1429_s19 = scalar_lea.hbm %s1991_s1, 6144 }
  0x13   : > { %p1722_p11 = pnand %p1333_p9, %p1998_p1  ;;  %s1728_s16 = sshll.u32 %s1621_s15, 4  ;;  %s253_s16 = int_to_ptr.vmem [resolvable:$true] %s1728_s16 }
  0x14   : > { %p1430_p12 = scmp.ne.s32.totalorder %s1991_s1, %s1429_s19  ;;  %p1436_p5 = scmp.lt.u32.totalorder %s1429_s19, %s1991_s1 }
  0x15   : > { %p1738_p13 = pneg %p1722_p11 }
  0x17   : > { %p1432_p0 = pnand %p1738_p13, %p1430_p12 }
  0x19   : > { %p1433_p3 = pneg %p1432_p0 }
  0x1b   : > { %p1438_p7 = pnand %p1436_p5, %p1433_p3 }
  0x1d   : > { %1441 = shalt.err (!%p1438_p7)
}
  0x1e   : > { %s1442_s10 = scalar_lea.vmem %s1715_s11, 6144  ;;  %p1450_p2 = scmp.lt.s32.totalorder %s1715_s11, %s1715_s11 }
  0x1f   : > { %p1443_p9 = scmp.ne.s32.totalorder %s1715_s11, %s1442_s10  ;;  %p1451_p6 = scmp.lt.s32.totalorder %s1442_s10, %s1442_s10 }
  0x21   : > { %p1445_p10 = pnand %p1443_p9, %p1738_p13  ;;  %p1452_p12 = por %p1451_p6, %p1450_p2 }
  0x23   : > { %p1446_p1 = pneg %p1445_p10 }
  0x25   : > { %p1453_p0 = pnand %p1452_p12, %p1446_p1 }
  0x27   : > { %1456 = shalt.err (!%p1453_p0)
}
  0x28   : > { %s1622_s13 = smov 384   ;;  %s1623_s15 = smov 24  }
  0x29   : > { %1336 = dma.hbm_to_vmem [thread:$0]  (!%p1722_p11), %s1991_s1, 6144, %s1715_s11, [#allocation6], %s1622_s13, %s1622_s13, %s1623_s15  }
  0x2a   : > { %s1457_s21 = scalar_lea.hbm %s1993_s3, 6144 }
  0x2b   : > { %p1458_p2 = scmp.ne.s32.totalorder %s1993_s3, %s1457_s21  ;;  %p1464_p10 = scmp.lt.u32.totalorder %s1457_s21, %s1993_s3 }
  0x2d   : > { %p1460_p1 = pnand %p1458_p2, %p1738_p13 }
  0x2f   : > { %p1461_p6 = pneg %p1460_p1 }
  0x31   : > { %p1466_p3 = pnand %p1464_p10, %p1461_p6 }
  0x33   : > { %1469 = shalt.err (!%p1466_p3)
}
  0x34   : > { %s1470_s11 = scalar_lea.vmem %s1726_s14, 6144  ;;  %p1478_p12 = scmp.lt.s32.totalorder %s1726_s14, %s1726_s14 }
  0x35   : > { %p1471_p5 = scmp.ne.s32.totalorder %s1726_s14, %s1470_s11  ;;  %p1479_p0 = scmp.lt.s32.totalorder %s1470_s11, %s1470_s11 }
  0x37   : > { %p1473_p7 = pnand %p1471_p5, %p1738_p13  ;;  %p1480_p2 = por %p1479_p0, %p1478_p12 }
  0x39   : > { %p1474_p9 = pneg %p1473_p7 }
  0x3b   : > { %p1481_p1 = pnand %p1480_p2, %p1474_p9 }
  0x3d   : > { %1484 = shalt.err (!%p1481_p1)
}
  0x3e   : > { %1339 = dma.hbm_to_vmem [thread:$0]  (!%p1722_p11), %s1993_s3, 6144, %s1726_s14, [#allocation6], %s1622_s13, %s1622_s13, %s1623_s15  }
  0x3f   : > { %s1485_s20 = scalar_lea.hbm %s1995_s5, 2048 }
  0x40   : > { %p1486_p6 = scmp.ne.s32.totalorder %s1995_s5, %s1485_s20  ;;  %p1492_p5 = scmp.lt.u32.totalorder %s1485_s20, %s1995_s5 }
  0x42   : > { %p1488_p10 = pnand %p1486_p6, %p1738_p13 }
  0x44   : > { %p1489_p3 = pneg %p1488_p10 }
  0x46   : > { %p1494_p7 = pnand %p1492_p5, %p1489_p3 }
  0x48   : > { %1497 = shalt.err (!%p1494_p7)
}
  0x49   : > { %s1498_s11 = scalar_lea.vmem %s253_s16, 2048  ;;  %p1506_p2 = scmp.lt.s32.totalorder %s253_s16, %s253_s16 }
  0x4a   : > { %p1499_p9 = scmp.ne.s32.totalorder %s253_s16, %s1498_s11  ;;  %p1507_p1 = scmp.lt.s32.totalorder %s1498_s11, %s1498_s11 }
  0x4c   : > { %p1501_p12 = pnand %p1499_p9, %p1738_p13  ;;  %p1508_p4 = por %p1507_p1, %p1506_p2 }
  0x4e   : > { %p1502_p0 = pneg %p1501_p12 }
  0x50   : > { %p1509_p8 = pnand %p1508_p4, %p1502_p0 }
  0x52   : > { %1512 = shalt.err (!%p1509_p8)
}
  0x53   : > { %s1624_s14 = smov 128   ;;  %s1625_s22 = smov 8  }
  0x54   : > { %1342 = dma.hbm_to_vmem [thread:$0]  (!%p1722_p11), %s1995_s5, 2048, %s253_s16, [#allocation9], %s1624_s14, %s1624_s14, %s1625_s22  }
  0x55   : > { %s1802_s8 = sadd.s32 1, %s1617_s27   ;;  %s32_s18 = sadd.s32 1, %s1613_s26 }
  0x56   : > { %s29_s17 = ssub.s32 %s1617_s27, %s1802_s8  ;;  %p39_p8 = scmp.ne.s32.totalorder %s1613_s26, %s1609_s25 }
  0x57   : > { %p30_p4 = scmp.eq.s32.totalorder %s29_s17, 0  ;;  %p40_p13 = scmp.eq.s32.totalorder %s1617_s27, 0 }
  0x58   : > { %p1354_p6 = scmp.lt.s32.totalorder %s1617_s27, 2  ;;  %p2008_p3 = scmp.eq.s32.totalorder %s1692_s28, 1 }
  0x59   : > { %s1812_s19 = scalar_select %p30_p4, %s1613_s26, %s32_s18  }
  0x5a   : > { %p41_p10 = por %p40_p13, %p39_p8  ;;  %p1816_p5 = por %p2008_p3, %p39_p8 }
  0x5b   : > { %s269_s12 = sand.u32 1, %s1613_s26   ;;  %s1009_s21 = sshll.u32 %s1617_s27, 7 }
  0x5c   : > { %s1008_s16 = sshll.u32 %s269_s12, 3  ;;  %s1825_s10 = scalar_lea.hbm %s1990_s0, %s1009_s21 }
  0x5d   : > { %s273_s11 = scalar_lea.vmem [#allocation2], %s1008_s16  ;;  %p1827_p11 = pnand %p1354_p6, %p41_p10 }
  0x5e   : > { %s280_s14 = sshll.u32 %s273_s11, 4  ;;  %s270_s13 = scalar_lea.sflag [#allocation3], %s269_s12  ;;  %s1831_s14 = int_to_ptr.vmem [resolvable:$true] %s280_s14 }
  0x5f   : > { %s1513_s15 = scalar_lea.hbm %s1825_s10, 128  ;;  %p1515_p9 = pneg %p1827_p11 }
  0x60   : > { %p1514_p7 = scmp.ne.s32.totalorder %s1825_s10, %s1513_s15  ;;  %s1518_s21 = scalar_lea.hbm %s1990_s0, 256 }
  0x61   : > { %p1519_p2 = scmp.lt.u32.totalorder %s1825_s10, %s1990_s0  ;;  %p1520_p1 = scmp.lt.u32.totalorder %s1518_s21, %s1513_s15 }
  0x62   : > { %p1516_p12 = pnand %p1515_p9, %p1514_p7  ;;  %p1522_p8 = scmp.lt.u32.totalorder %s1513_s15, %s1825_s10 }
  0x63   : > { %p1521_p4 = por %p1520_p1, %p1519_p2 }
  0x64   : > { %p1517_p0 = pneg %p1516_p12 }
  0x65   : > { %p1523_p13 = por %p1522_p8, %p1521_p4 }
  0x67   : > { %p1524_p6 = pnand %p1523_p13, %p1517_p0 }
  0x69   : > { %1527 = shalt.err (!%p1524_p6)
}
  0x6a   : > { %s1528_s12 = scalar_lea.vmem %s1831_s14, 128  ;;  %s1626_s29 = smov [#allocation2]  }
  0x6b   : > { %p1529_p10 = scmp.ne.s32.totalorder %s1831_s14, %s1528_s12  ;;  %s1533_s11 = sshll.u32 %s1626_s29, 4  ;;  %s1534_s11 = int_to_ptr.vmem [resolvable:$false] %s1533_s11 }
  0x6c   : > { %s1535_s17 = scalar_lea.vmem %s1534_s11, 256  ;;  %p1536_p12 = scmp.lt.s32.totalorder %s1831_s14, %s1534_s11 }
  0x6d   : > { %p1531_p3 = pnand %p1529_p10, %p1515_p9  ;;  %p1537_p2 = scmp.lt.s32.totalorder %s1535_s17, %s1528_s12 }
  0x6f   : > { %p1532_p7 = pneg %p1531_p3  ;;  %p1538_p1 = por %p1537_p2, %p1536_p12 }
  0x71   : > { %p1539_p4 = pnand %p1538_p1, %p1532_p7 }
  0x73   : > { %1542 = shalt.err (!%p1539_p4)
}
  0x74   : > { %1346 = dma.hbm_to_vmem [thread:$0]  (!%p1827_p11), %s1825_s10, 128, %s1831_s14, %s270_s13  }
  0x75   : > { %p2011_p0 = scmp.ne.s32.totalorder %s2005_s9, 0 }
  0x76   : > { %s1861_s15 = sand.u32 (!%p2011_p0), 1, %s1609_s25   ;;  %p2012_p9 = scmp.ne.s32.totalorder (!%p2011_p0), %s2002_s30, 0 }
  0x77   : > { %289 = sbr.rel (%p2011_p0) target bundleno = 1226 (0x4ca), region = 48  ;;  %s1011_s18 = sshll.u32 (!%p2011_p0), %s1861_s15, 3 }
  0x78   : > { %s292_s21 = scalar_lea.sflag (!%p2011_p0), [#allocation3], %s1861_s15  ;;  %s1867_s16 = scalar_lea.vmem (!%p2011_p0), [#allocation2], %s1011_s18 }
  0x7e   : > { %1588 = dma.done.wait (%p2012_p9), %s292_s21, 128  }
  0x7f   : > { %1590 = vsyncadd (%p2012_p9), %s292_s21, 4294967168  ;;  %p2013_p11 = scmp.eq.s32.totalorder %s1692_s28, 0 }
  0x81   : > { %1592 = dma.done.wait (%p2013_p11), [#allocation6], 12288   ;;  %p2014_p8 = pmov %p2013_p11 }
  0x83   : > { %1594 = vsyncadd (%p2014_p8), [#allocation6], 4294955008  ;;  %p2015_p13 = pmov %p2014_p8 }
  0x84   : > { %p2016_p6 = pmov %p2014_p8 }
  0x85   : > { %1596 = dma.done.wait (%p2015_p13), [#allocation9], 2048  }
  0x86   : > { %1598 = vsyncadd (%p2016_p6), [#allocation9], 4294965248  ;;  %v1627_v0 = vmov 0.0|0.0   ;;  %v1628_v1 = vmov 0.0   ;;  %vm1629_vm0 = vmmov 0   ;;  %v340_v2 = vld [vmem:[#allocation5 + $0x8] sm:$0xff] }
  0x87   : > { %1213 = vmatprep.subr.bf16.mxu1 %v1627_v0  ;;  %468 = vmatprep.mubr.f32.mxu0 %v1628_v1  ;;  %v343_v3 = vld [vmem:[#allocation5 + $0x20] sm:$0xff]  ;;  %v342_v6 = vld [vmem:[#allocation5 + $0x18] sm:$0xff]  ;;  %v349_v8 = vld [vmem:[#allocation5 + $0x50] sm:$0xff]  ;;  %s1022_s23 = sshll.u32 %s1692_s28, 7  ;;  %s337_s12 = scalar_lea.vmem [#allocation10], %s1011_s18 }
  0x88   : > { %1108 = vmatprep.mubr.msk.f32.mxu1 %vm1629_vm0, %v1628_v1  ;;  %v339_v4 = vld [vmem:[#allocation5] sm:$0xff]  ;;  %v1181_v5 = vpack.c.bf16 %v343_v3, %v340_v2  ;;  %v346_v7 = vld [vmem:[#allocation5 + $0x38] sm:$0xff]  ;;  %v345_v11 = vld [vmem:[#allocation5 + $0x30] sm:$0xff]  ;;  %s903_s29 = sshll.u32 %s337_s12, 4  ;;  %s1946_s21 = scalar_lea.hbm %s1997_s7, %s1022_s23  ;;  %s1948_s29 = int_to_ptr.vmem [resolvable:$true] %s903_s29 }
  0x89   : > { %v1183_v9 = vpack.c.bf16 %v342_v6, %v339_v4  ;;  %v1185_v10 = vpack.c.bf16 %v349_v8, %v346_v7  ;;  %v348_v12 = vld [vmem:[#allocation5 + $0x48] sm:$0xff]  ;;  %v355_v14 = vld [vmem:[#allocation5 + $0x80] sm:$0xff]  ;;  %v354_v18 = vld [vmem:[#allocation5 + $0x78] sm:$0xff]  ;;  %s1543_s30 = scalar_lea.vmem %s1948_s29, 128  ;;  %s1630_s28 = smov [#allocation10]  }
  0x8a   : > { %v352_v13 = vld [vmem:[#allocation5 + $0x68] sm:$0xff]  ;;  %1182 = vmatprep.subr.bf16.mxu0 %v1181_v5  ;;  %v1187_v15 = vpack.c.bf16 %v348_v12, %v345_v11  ;;  %v351_v16 = vld [vmem:[#allocation5 + $0x60] sm:$0xff]  ;;  %v341_v19 = vld [vmem:[#allocation5 + $0x10] sm:$0xff]  ;;  %p1544_p10 = scmp.ne.s32.totalorder %s1948_s29, %s1543_s30  ;;  %s1547_s18 = sshll.u32 %s1630_s28, 4  ;;  %s1548_s18 = int_to_ptr.vmem [resolvable:$false] %s1547_s18 }
  0x8b   : > { %1184 = vmatpush1.bf16.msra.mxu0 %v1183_v9  ;;  %v1189_v17 = vpack.c.bf16 %v355_v14, %v352_v13  ;;  %v344_v20 = vld [vmem:[#allocation5 + $0x28] sm:$0xff]  ;;  %v358_v21 = vld [vmem:[#allocation5 + $0x98] sm:$0xff]  ;;  %v361_v22 = vld [vmem:[#allocation5 + $0xb0] sm:$0xff]  ;;  %v1191_v26 = vpack.c.bf16 %v354_v18, %v351_v16  ;;  %s1549_s9 = scalar_lea.vmem %s1548_s18, 256  ;;  %p1550_p12 = scmp.lt.s32.totalorder %s1948_s29, %s1548_s18 }
  0x8c   : > { %1186 = vmatprep.subr.bf16.mxu0 %v1185_v10  ;;  %v1214_v23 = vpack.c.bf16 %v344_v20, %v341_v19  ;;  %v347_v24 = vld [vmem:[#allocation5 + $0x40] sm:$0xff]  ;;  %v350_v25 = vld [vmem:[#allocation5 + $0x58] sm:$0xff]  ;;  %v357_v27 = vld [vmem:[#allocation5 + $0x90] sm:$0xff]  ;;  %v1193_v29 = vpack.c.bf16 %v361_v22, %v358_v21  ;;  %p1545_p3 = pnand %p1544_p10, %p1816_p5  ;;  %p1551_p2 = scmp.lt.s32.totalorder %s1549_s9, %s1543_s30 }
  0x8d   : > { %v1217_v28 = vpack.c.bf16 %v350_v25, %v347_v24  ;;  %v360_v30 = vld [vmem:[#allocation5 + $0xa8] sm:$0xff]  ;;  %v353_v31 = vld [vmem:[#allocation5 + $0x70] sm:$0xff]  ;;  %v367_v34 = vld [vmem:[#allocation5 + $0xe0] sm:$0xff] }
  0x8e   : > { %1215 = vmatpush3.bf16.msra.mxu1 %v1214_v23  ;;  %v356_v32 = vld [vmem:[#allocation5 + $0x88] sm:$0xff]  ;;  %v1195_v35 = vpack.c.bf16 %v360_v30, %v357_v27  ;;  %v363_v36 = vld [vmem:[#allocation5 + $0xc0] sm:$0xff]  ;;  %v366_v39 = vld [vmem:[#allocation5 + $0xd8] sm:$0xff]  ;;  %p1546_p7 = pneg %p1545_p3  ;;  %p1552_p1 = por %p1551_p2, %p1550_p12 }
  0x8f   : > { %1188 = vmatpush1.bf16.msra.mxu0 %v1187_v15  ;;  %1216 = vmatprep.subr.bf16.mxu1 %v1627_v0  ;;  %v364_v33 = vld [vmem:[#allocation5 + $0xc8] sm:$0xff]  ;;  %v1220_v37 = vpack.c.bf16 %v356_v32, %v353_v31  ;;  %v359_v40 = vld [vmem:[#allocation5 + $0xa0] sm:$0xff]  ;;  %v362_v41 = vld [vmem:[#allocation5 + $0xb8] sm:$0xff]  ;;  %v1199_v44 = vpack.c.bf16 %v366_v39, %v363_v36 }
  0x90   : > { %1190 = vmatprep.subr.bf16.mxu0 %v1189_v17  ;;  %v1197_v38 = vpack.c.bf16 %v367_v34, %v364_v33  ;;  %v370_v42 = vld [vmem:[#allocation5 + $0xf8] sm:$0xff]  ;;  %v373_v43 = vld [vmem:[#allocation5 + $0x110] sm:$0xff]  ;;  %v1223_v46 = vpack.c.bf16 %v362_v41, %v359_v40  ;;  %v372_v48 = vld [vmem:[#allocation5 + $0x108] sm:$0xff]  ;;  %p1553_p4 = pnand %p1552_p1, %p1546_p7 }
  0x91   : > { %v369_v45 = vld [vmem:[#allocation5 + $0xf0] sm:$0xff]  ;;  %v1201_v47 = vpack.c.bf16 %v373_v43, %v370_v42  ;;  %v368_v50 = vld [vmem:[#allocation5 + $0xe8] sm:$0xff]  ;;  %v379_v52 = vld [vmem:[#allocation5 + $0x140] sm:$0xff] }
  0x92   : > { %1218 = vmatpush3.bf16.msra.mxu1 %v1217_v28  ;;  %v365_v49 = vld [vmem:[#allocation5 + $0xd0] sm:$0xff]  ;;  %v376_v51 = vld [vmem:[#allocation5 + $0x128] sm:$0xff]  ;;  %v1203_v53 = vpack.c.bf16 %v372_v48, %v369_v45  ;;  %v375_v54 = vld [vmem:[#allocation5 + $0x120] sm:$0xff] }
  0x93   : > { %1192 = vmatpush1.bf16.msra.mxu0 %v1191_v26  ;;  %1219 = vmatprep.subr.bf16.mxu1 %v1627_v0  ;;  %v1226_v55 = vpack.c.bf16 %v368_v50, %v365_v49  ;;  %v1205_v56 = vpack.c.bf16 %v379_v52, %v376_v51  ;;  %v378_v57 = vld [vmem:[#allocation5 + $0x138] sm:$0xff]  ;;  %v371_v58 = vld [vmem:[#allocation5 + $0x100] sm:$0xff]  ;;  %v385_v61 = vld [vmem:[#allocation5 + $0x170] sm:$0xff] }
  0x94   : > { %1194 = vmatprep.subr.bf16.mxu0 %v1193_v29  ;;  %v374_v59 = vld [vmem:[#allocation5 + $0x118] sm:$0xff]  ;;  %v1207_v62 = vpack.c.bf16 %v378_v57, %v375_v54  ;;  %v381_v63 = vld [vmem:[#allocation5 + $0x150] sm:$0xff]  ;;  %v384_v4 = vld [vmem:[#allocation5 + $0x168] sm:$0xff] }
  0x95   : > { %v382_v60 = vld [vmem:[#allocation5 + $0x158] sm:$0xff]  ;;  %v1229_v2 = vpack.c.bf16 %v374_v59, %v371_v58  ;;  %v377_v5 = vld [vmem:[#allocation5 + $0x130] sm:$0xff]  ;;  %v380_v6 = vld [vmem:[#allocation5 + $0x148] sm:$0xff]  ;;  %v1211_v7 = vpack.c.bf16 %v384_v4, %v381_v63 }
  0x96   : > { %1221 = vmatpush3.bf16.msra.mxu1 %v1220_v37  ;;  %v1209_v3 = vpack.c.bf16 %v385_v61, %v382_v60  ;;  %v1232_v8 = vpack.c.bf16 %v380_v6, %v377_v5  ;;  %v383_v9 = vld [vmem:[#allocation5 + $0x160] sm:$0xff]  ;;  %v386_v10 = vld [vmem:[#allocation5 + $0x178] sm:$0xff]  ;;  %v562_v13 = vld [vmem:[#allocation7 + $0x8] sm:$0xff] }
  0x97   : > { %1196 = vmatpush1.bf16.msra.mxu0 %v1195_v35  ;;  %1222 = vmatprep.subr.bf16.mxu1 %v1627_v0  ;;  %v338_v11 = vld [vmem:[%s1867_s16] sm:$0xff]  ;;  %v1235_v12 = vpack.c.bf16 %v386_v10, %v383_v9  ;;  %v565_v14 = vld [vmem:[#allocation7 + $0x20] sm:$0xff]  ;;  %v566_v20 = vld [vmem:[#allocation7 + $0x28] sm:$0xff]  ;;  %s890_s16 = scalar_lea.sflag [#allocation4], %s1861_s15 }
  0x98   : > { %1198 = vmatprep.subr.bf16.mxu0 %v1197_v38  ;;  %v1237_v15 = vpack.c.bf16 %v565_v14, %v562_v13  ;;  %v561_v16 = vld [vmem:[#allocation7] sm:$0xff]  ;;  %v564_v17 = vld [vmem:[#allocation7 + $0x18] sm:$0xff]  ;;  %v563_v18 = vld [vmem:[#allocation7 + $0x10] sm:$0xff] }
  0x99   : > { %v1239_v19 = vpack.c.bf16 %v564_v17, %v561_v16  ;;  %v1270_v21 = vpack.c.bf16 %v566_v20, %v563_v18  ;;  %v568_v22 = vld [vmem:[#allocation7 + $0x38] sm:$0xff]  ;;  %v571_v23 = vld [vmem:[#allocation7 + $0x50] sm:$0xff]  ;;  %v570_v26 = vld [vmem:[#allocation7 + $0x48] sm:$0xff] }
  0x9a   : > { %1224 = vmatpush3.bf16.msra.mxu1 %v1223_v46  ;;  %v1241_v24 = vpack.c.bf16 %v571_v23, %v568_v22  ;;  %v567_v25 = vld [vmem:[#allocation7 + $0x30] sm:$0xff]  ;;  %v569_v27 = vld [vmem:[#allocation7 + $0x40] sm:$0xff]  ;;  %v572_v29 = vld [vmem:[#allocation7 + $0x58] sm:$0xff]  ;;  %v389_v23 = vlaneseq }
  0x9b   : > { %1200 = vmatpush1.bf16.msra.mxu0 %v1199_v44  ;;  %1225 = vmatprep.subr.bf16.mxu1 %v1627_v0  ;;  %v1243_v28 = vpack.c.bf16 %v570_v26, %v567_v25  ;;  %v1273_v30 = vpack.c.bf16 %v572_v29, %v569_v27  ;;  %v574_v31 = vld [vmem:[#allocation7 + $0x68] sm:$0xff]  ;;  %v577_v32 = vld [vmem:[#allocation7 + $0x80] sm:$0xff]  ;;  %v576_v35 = vld [vmem:[#allocation7 + $0x78] sm:$0xff] }
  0x9c   : > { %1202 = vmatprep.subr.bf16.mxu0 %v1201_v47  ;;  %v1245_v33 = vpack.c.bf16 %v577_v32, %v574_v31  ;;  %v573_v34 = vld [vmem:[#allocation7 + $0x60] sm:$0xff]  ;;  %v575_v36 = vld [vmem:[#allocation7 + $0x70] sm:$0xff]  ;;  %v578_v38 = vld [vmem:[#allocation7 + $0x88] sm:$0xff] }
  0x9d   : > { %v1247_v37 = vpack.c.bf16 %v576_v35, %v573_v34  ;;  %v1276_v39 = vpack.c.bf16 %v578_v38, %v575_v36  ;;  %v580_v40 = vld [vmem:[#allocation7 + $0x98] sm:$0xff]  ;;  %v583_v41 = vld [vmem:[#allocation7 + $0xb0] sm:$0xff]  ;;  %v582_v44 = vld [vmem:[#allocation7 + $0xa8] sm:$0xff] }
  0x9e   : > { %1227 = vmatpush3.bf16.msra.mxu1 %v1226_v55  ;;  %v1249_v42 = vpack.c.bf16 %v583_v41, %v580_v40  ;;  %v579_v43 = vld [vmem:[#allocation7 + $0x90] sm:$0xff]  ;;  %v581_v45 = vld [vmem:[#allocation7 + $0xa0] sm:$0xff]  ;;  %v584_v47 = vld [vmem:[#allocation7 + $0xb8] sm:$0xff] }
  0x9f   : > { %1204 = vmatpush1.bf16.msra.mxu0 %v1203_v53  ;;  %1228 = vmatprep.subr.bf16.mxu1 %v1627_v0  ;;  %v1251_v46 = vpack.c.bf16 %v582_v44, %v579_v43  ;;  %v1279_v48 = vpack.c.bf16 %v584_v47, %v581_v45  ;;  %v586_v49 = vld [vmem:[#allocation7 + $0xc8] sm:$0xff]  ;;  %v589_v50 = vld [vmem:[#allocation7 + $0xe0] sm:$0xff]  ;;  %v588_v53 = vld [vmem:[#allocation7 + $0xd8] sm:$0xff] }
  0xa0   : > { %1206 = vmatprep.subr.bf16.mxu0 %v1205_v56  ;;  %v1253_v51 = vpack.c.bf16 %v589_v50, %v586_v49  ;;  %v585_v52 = vld [vmem:[#allocation7 + $0xc0] sm:$0xff]  ;;  %v587_v54 = vld [vmem:[#allocation7 + $0xd0] sm:$0xff]  ;;  %v590_v56 = vld [vmem:[#allocation7 + $0xe8] sm:$0xff] }
  0xa1   : > { %v1255_v55 = vpack.c.bf16 %v588_v53, %v585_v52  ;;  %v1282_v57 = vpack.c.bf16 %v590_v56, %v587_v54  ;;  %v592_v58 = vld [vmem:[#allocation7 + $0xf8] sm:$0xff]  ;;  %v595_v59 = vld [vmem:[#allocation7 + $0x110] sm:$0xff]  ;;  %v593_v63 = vld [vmem:[#allocation7 + $0x100] sm:$0xff] }
  0xa2   : > { %1230 = vmatpush3.bf16.msra.mxu1 %v1229_v2  ;;  %v1257_v60 = vpack.c.bf16 %v595_v59, %v592_v58  ;;  %v591_v61 = vld [vmem:[#allocation7 + $0xf0] sm:$0xff]  ;;  %v598_v4 = vld [vmem:[#allocation7 + $0x128] sm:$0xff]  ;;  %v601_v5 = vld [vmem:[#allocation7 + $0x140] sm:$0xff] }
  0xa3   : > { %1208 = vmatpush1.bf16.msra.mxu0 %v1207_v62  ;;  %1231 = vmatprep.subr.bf16.mxu1 %v1627_v0  ;;  %v594_v62 = vld [vmem:[#allocation7 + $0x108] sm:$0xff]  ;;  %v600_v9 = vld [vmem:[#allocation7 + $0x138] sm:$0xff]  ;;  %v599_v10 = vld [vmem:[#allocation7 + $0x130] sm:$0xff] }
  0xa4   : > { %1210 = vmatprep.subr.bf16.mxu0 %v1209_v3  ;;  %v1259_v2 = vpack.c.bf16 %v594_v62, %v591_v61  ;;  %v596_v3 = vld [vmem:[#allocation7 + $0x118] sm:$0xff]  ;;  %v607_v14 = vld [vmem:[#allocation7 + $0x170] sm:$0xff]  ;;  %v606_v18 = vld [vmem:[#allocation7 + $0x168] sm:$0xff] }
  0xa5   : > { %v1285_v6 = vpack.c.bf16 %v596_v3, %v593_v63  ;;  %v604_v13 = vld [vmem:[#allocation7 + $0x158] sm:$0xff]  ;;  %v603_v17 = vld [vmem:[#allocation7 + $0x150] sm:$0xff]  ;;  %v784_v52 = vld [vmem:[#allocation8 + $0x8] sm:$0xff] }
  0xa6   : > { %1233 = vmatpush3.bf16.msra.mxu1 %v1232_v8  ;;  %v597_v8 = vld [vmem:[#allocation7 + $0x120] sm:$0xff]  ;;  %v1265_v16 = vpack.c.bf16 %v607_v14, %v604_v13  ;;  %v608_v20 = vld [vmem:[#allocation7 + $0x178] sm:$0xff]  ;;  %v387_v26 = vld [vmem:[%s1992_s2] sm:$0x7] }
  0xa7   : > { %1212 = vmatpush1.bf16.msra.mxu0 %v1211_v7  ;;  %1234 = vmatprep.subr.bf16.mxu1 %v1627_v0  ;;  %v1261_v7 = vpack.c.bf16 %v601_v5, %v598_v4  ;;  %v785_v54 = vld [vmem:[#allocation8 + $0x10] sm:$0xff]  ;;  %v788_v58 = vld [vmem:[#allocation8 + $0x28] sm:$0xff]  ;;  %v791_v62 = vld [vmem:[#allocation8 + $0x40] sm:$0xff] }
  0xa8   : > { %1238 = vmatprep.subr.bf16.mxu0 %v1237_v15  ;;  %v792_v63 = vld [vmem:[#allocation8 + $0x48] sm:$0xff]  ;;  %v793_v3 = vld [vmem:[#allocation8 + $0x50] sm:$0xff]  ;;  %v794_v4 = vld [vmem:[#allocation8 + $0x58] sm:$0xff] }
  0xa9   : > { %v1309_v5 = vpack.c.bf16 %v794_v4, %v793_v3 }
  0xaa   : > { %469 = vmatmul.mubr.f32.vlgmr.msra.gmra.mrb[0].mxu0 %v338_v11  ;;  %1236 = vmatpush3.bf16.msra.mxu1 %v1235_v12  ;;  %v602_v12 = vld [vmem:[#allocation7 + $0x148] sm:$0xff] }
  0xab   : > { %690 = vmatprep.mubr.f32.mxu0 %v1628_v1  ;;  %1269 = vmatprep.subr.bf16.mxu1 %v1627_v0  ;;  %v1288_v15 = vpack.c.bf16 %v602_v12, %v599_v10  ;;  %v798_v10 = vld [vmem:[#allocation8 + $0x78] sm:$0xff]  ;;  %v609_v12 = vld [vmem:[%s1994_s4] sm:$0x7] }
  0xac   : > { %1240 = vmatpush1.bf16.msra.mxu0 %v1239_v19  ;;  %v605_v19 = vld [vmem:[#allocation7 + $0x160] sm:$0xff] }
  0xad   : > { %1109 = vmatmul.mubr.f32.vlgmr.msra.gmra.mrb[0].mxu1 %v338_v11  ;;  %1242 = vmatprep.subr.bf16.mxu0 %v1241_v24  ;;  %v1263_v11 = vpack.c.bf16 %v600_v9, %v597_v8  ;;  %v1291_v22 = vpack.c.bf16 %v608_v20, %v605_v19  ;;  %v1905_v24 = vshrl.u32 %v389_v23, 7  ;;  %v797_v9 = vld [vmem:[#allocation8 + $0x70] sm:$0xff] }
  0xae   : > { %1143 = vmatprep.mubr.msk.f32.mxu1 %vm1629_vm0, %v1628_v1  ;;  %1271 = vmatpush3.bf16.msra.mxu1 %v1270_v21  ;;  %v1267_v21 = vpack.c.bf16 %v606_v18, %v603_v17 }
  0xaf   : > { %1272 = vmatprep.subr.bf16.mxu1 %v1627_v0  ;;  %v391_v25 = vsub.s32 0, %v1905_v24  ;;  %v399_v34 = vsub.s32 2, %v1905_v24 }
  0xb0   : > { %1244 = vmatpush1.bf16.msra.mxu0 %v1243_v28  ;;  %v395_v28 = vsub.s32 1, %v1905_v24  ;;  %v1020_v24 = vld [vmem:[%s1996_s6] ss:$0 sm:$0xff] }
  0xb1   : > { %1246 = vmatprep.subr.bf16.mxu0 %v1245_v33  ;;  %v392_v27 = vrot.slane %v387_v26, %v391_v25  ;;  %v400_v38 = vrot.slane %v387_v26, %v399_v34  ;;  %v614_v13 = vrot.slane %v609_v12, %v391_v25 }
  0xb2   : > { %1274 = vmatpush3.bf16.msra.mxu1 %v1273_v30  ;;  %v396_v31 = vrot.slane %v387_v26, %v395_v28  ;;  %v618_v17 = vrot.slane %v609_v12, %v395_v28 }
  0xb3   : > { %1275 = vmatprep.subr.bf16.mxu1 %v1627_v0 }
  0xb4   : > { %1248 = vmatpush1.bf16.msra.mxu0 %v1247_v37 }
  0xb5   : > { %1250 = vmatprep.subr.bf16.mxu0 %v1249_v42 }
  0xb6   : > { %1277 = vmatpush3.bf16.msra.mxu1 %v1276_v39 }
  0xb7   : > { %1278 = vmatprep.subr.bf16.mxu1 %v1627_v0 }
  0xb8   : > { %1252 = vmatpush1.bf16.msra.mxu0 %v1251_v46 }
  0xb9   : > { %1254 = vmatprep.subr.bf16.mxu0 %v1253_v51  ;;  %v783_v51 = vld [vmem:[#allocation8] sm:$0xff] }
  0xba   : > { %1280 = vmatpush3.bf16.msra.mxu1 %v1279_v48  ;;  %v1294_v53 = vpack.c.bf16 %v784_v52, %v783_v51 }
  0xbb   : > { %1281 = vmatprep.subr.bf16.mxu1 %v1627_v0 }
  0xbc   : > { %1256 = vmatpush1.bf16.msra.mxu0 %v1255_v55  ;;  %v786_v55 = vld [vmem:[#allocation8 + $0x18] sm:$0xff] }
  0xbd   : > { %1258 = vmatprep.subr.bf16.mxu0 %v1257_v60  ;;  %v1297_v56 = vpack.c.bf16 %v786_v55, %v785_v54  ;;  %v789_v60 = vld [vmem:[#allocation8 + $0x30] sm:$0xff] }
  0xbe   : > { %1283 = vmatpush3.bf16.msra.mxu1 %v1282_v57  ;;  %v787_v57 = vld [vmem:[#allocation8 + $0x20] sm:$0xff] }
  0xbf   : > { %1284 = vmatprep.subr.bf16.mxu1 %v1627_v0  ;;  %v1300_v59 = vpack.c.bf16 %v788_v58, %v787_v57 }
  0xc0   : > { %1260 = vmatpush1.bf16.msra.mxu0 %v1259_v2  ;;  %v1306_v2 = vpack.c.bf16 %v792_v63, %v791_v62 }
  0xc1   : > { %1262 = vmatprep.subr.bf16.mxu0 %v1261_v7  ;;  %v796_v7 = vld [vmem:[#allocation8 + $0x68] sm:$0xff] }
  0xc2   : > { %1286 = vmatpush3.bf16.msra.mxu1 %v1285_v6  ;;  %v795_v6 = vld [vmem:[#allocation8 + $0x60] sm:$0xff] }
  0xc3   : > { %1287 = vmatprep.subr.bf16.mxu1 %v1627_v0  ;;  %v1312_v8 = vpack.c.bf16 %v796_v7, %v795_v6 }
  0xc4   : > { %1264 = vmatpush1.bf16.msra.mxu0 %v1263_v11  ;;  %v1315_v11 = vpack.c.bf16 %v798_v10, %v797_v9 }
  0xc5   : > { %1266 = vmatprep.subr.bf16.mxu0 %v1265_v16 }
  0xc6   : > { %1289 = vmatpush3.bf16.msra.mxu1 %v1288_v15 }
  0xc7   : > { %1290 = vmatprep.subr.bf16.mxu1 %v1627_v0 }
  0xc8   : > { %1268 = vmatpush1.bf16.msra.mxu0 %v1267_v21 }
  0xc9   : > { %1293 = vmatprep.subr.bf16.mxu0 %v1627_v0 }
  0xca   : > { %1292 = vmatpush3.bf16.msra.mxu1 %v1291_v22 }
 0x17d   : > { %v470_v29 = vpop.f32.mrb[0].mxu0 }
 0x17e   : > { %v471_v30 = vadd.f32 %v470_v29, %v392_v27  ;;  %v472_v32 = vpop.f32.mrb[1].mxu0 }
 0x17f   : > { %v473_v36 = vadd.f32 %v472_v32, %v396_v31 }
 0x180   : > { %v1016_v33 = vmul.f32 -1.442695, %v471_v30  ;;  %v541_v35 = vpop.f32.mrb[0].mxu1 }
 0x181   : > { %v1110_v37 = vpop.f32.mrb[1].mxu1  ;;  %v1017_v39 = vmul.f32 -1.442695, %v473_v36  ;;  %v542_v40 = vadd.f32 %v541_v35, %v400_v38 }
 0x182   : > { %1401 = vpow2.f32 %v1016_v33 }
 0x183   : > { %1403 = vpow2.f32 %v1017_v39 }
 0x184   : > { %1405 = vtanh.f32 %v542_v40 }
 0x18c   : > { %v1402_v41 = vpop.eup %1401 }
 0x18d   : > { %v548_v42 = vadd.f32 1.0, %v1402_v41  ;;  %v1404_v43 = vpop.eup %1403 }
 0x18e   : > { %v1406_v44 = vpop.eup %1405  ;;  %v554_v45 = vadd.f32 1.0, %v1404_v43 }
 0x18f   : > { %1407 = vrcp.f32 %v548_v42 }
 0x190   : > { %1409 = vrcp.f32 %v554_v45 }
 0x199   : > { %v1408_v46 = vpop.eup %1407 }
 0x19a   : > { %v558_v47 = vmul.f32 %v1408_v46, %v1406_v44  ;;  %v1410_v48 = vpop.eup %1409 }
 0x19c   : > { %1411 = vtanh.f32 %v558_v47 }
 0x1a6   : > { %v1412_v49 = vpop.eup %1411 }
 0x1a7   : > { %v560_v50 = vmul.f32 %v1412_v49, %v1410_v48 }
 0x1a9   : > { %691 = vmatmul.mubr.f32.vlgmr.msra.gmra.mrb[2].mxu0 %v560_v50  ;;  %1144 = vmatmul.mubr.f32.vlgmr.msra.gmra.mrb[2].mxu1 %v560_v50 }
 0x1aa   : > { %1178 = vmatprep.mubr.msk.f32.mxu0 %vm1629_vm0, %v1628_v1  ;;  %1295 = vmatpush3.bf16.msra.mxu0 %v1294_v53  ;;  %v790_v1 = vld [vmem:[#allocation8 + $0x38] sm:$0xff] }
 0x1ab   : > { %1296 = vmatprep.subr.bf16.mxu0 %v1627_v0  ;;  %v1303_v61 = vpack.c.bf16 %v790_v1, %v789_v60 }
 0x1ae   : > { %1298 = vmatpush3.bf16.msra.mxu0 %v1297_v56 }
 0x1af   : > { %1299 = vmatprep.subr.bf16.mxu0 %v1627_v0 }
 0x1b2   : > { %1301 = vmatpush3.bf16.msra.mxu0 %v1300_v59 }
 0x1b3   : > { %1302 = vmatprep.subr.bf16.mxu0 %v1627_v0 }
 0x1b6   : > { %1304 = vmatpush3.bf16.msra.mxu0 %v1303_v61 }
 0x1b7   : > { %1305 = vmatprep.subr.bf16.mxu0 %v1627_v0 }
 0x1ba   : > { %1307 = vmatpush3.bf16.msra.mxu0 %v1306_v2 }
 0x1bb   : > { %1308 = vmatprep.subr.bf16.mxu0 %v1627_v0 }
 0x1be   : > { %1310 = vmatpush3.bf16.msra.mxu0 %v1309_v5 }
 0x1bf   : > { %1311 = vmatprep.subr.bf16.mxu0 %v1627_v0 }
 0x1c2   : > { %1313 = vmatpush3.bf16.msra.mxu0 %v1312_v8 }
 0x1c3   : > { %1314 = vmatprep.subr.bf16.mxu0 %v1627_v0  ;;  %v622_v0 = vrot.slane %v609_v12, %v399_v34 }
 0x1c6   : > { %1316 = vmatpush3.bf16.msra.mxu0 %v1315_v11 }
 0x27c   : > { %v692_v14 = vpop.f32.mrb[2].mxu0  ;;  %v763_v15 = vpop.f32.mrb[2].mxu1 }
 0x27d   : > { %v693_v16 = vadd.f32 %v692_v14, %v614_v13  ;;  %v694_v18 = vpop.f32.mrb[3].mxu0  ;;  %v1145_v19 = vpop.f32.mrb[3].mxu1  ;;  %v764_v23 = vadd.f32 %v763_v15, %v622_v0 }
 0x27e   : > { %v695_v21 = vadd.f32 %v694_v18, %v618_v17 }
 0x27f   : > { %v1018_v20 = vmul.f32 -1.442695, %v693_v16 }
 0x280   : > { %v1019_v22 = vmul.f32 -1.442695, %v695_v21 }
 0x281   : > { %1413 = vpow2.f32 %v1018_v20 }
 0x282   : > { %1415 = vpow2.f32 %v1019_v22 }
 0x283   : > { %1417 = vtanh.f32 %v764_v23 }
 0x28b   : > { %v1414_v26 = vpop.eup %1413 }
 0x28c   : > { %v770_v27 = vadd.f32 1.0, %v1414_v26  ;;  %v1416_v25 = vpop.eup %1415 }
 0x28d   : > { %v776_v29 = vadd.f32 1.0, %v1416_v25  ;;  %v1418_v30 = vpop.eup %1417 }
 0x28e   : > { %1419 = vrcp.f32 %v770_v27 }
 0x28f   : > { %1421 = vrcp.f32 %v776_v29 }
 0x298   : > { %v1420_v31 = vpop.eup %1419 }
 0x299   : > { %v780_v28 = vmul.f32 %v1420_v31, %v1418_v30  ;;  %v1422_v32 = vpop.eup %1421 }
 0x29b   : > { %1423 = vtanh.f32 %v780_v28 }
 0x2a5   : > { %v1424_v33 = vpop.eup %1423 }
 0x2a6   : > { %v782_v35 = vmul.f32 %v1424_v33, %v1422_v32 }
 0x2a8   : > { %1179 = vmatmul.mubr.f32.vlgmr.msra.gmra.mrb[4].mxu0 %v782_v35 }
 0x37b   : > { %v872_v34 = vpop.f32.mrb[4].mxu0 }
 0x37c   : > { %v873_v36 = vadd.f32 %v1020_v24, %v872_v34  ;;  %v1180_v37 = vpop.f32.mrb[5].mxu0 }
 0x37e   : > { %876 = vmax.xlane.f32.xlu0 %v873_v36 }
 0x40b   : > { %v877_v38 = vpop.xlane.xlu0 %876 }
 0x40c   : > { %v878_v39 = vsub.f32 %v873_v36, %v877_v38 }
 0x40e   : > { %v879_v40 = vmul.f32 1.442695, %v878_v39 }
 0x410   : > { %1425 = vpow2.f32 %v879_v40 }
 0x41a   : > { %v1426_v41 = vpop.eup %1425 }
 0x41b   : > { %881 = vadd.xlane.f32.xlu0 %v1426_v41 }
 0x4a8   : > { %v882_v42 = vpop.xlane.xlu0 %881 }
 0x4a9   : > { %1427 = vrcp.f32 %v882_v42 }
 0x4b3   : > { %v1428_v43 = vpop.eup %1427 }
 0x4b4   : > { %v884_v44 = vmul.f32 %v1428_v43, %v882_v42 }
 0x4b6   : > { %v885_v45 = vsub.f32 2.0, %v884_v44 }
 0x4b8   : > { %v886_v46 = vmul.f32 %v1428_v43, %v885_v45 }
 0x4ba   : > { %v887_v47 = vmul.f32 %v1426_v41, %v886_v46 }
 0x4bc   : > { %888 = vst [vmem:[%s337_s12] sm:$0xff] %v887_v47 }
 0x4bd   : > { %1556 = shalt.err (!%p1553_p4)
}
 0x4be   : > { %s1557_s15 = scalar_lea.hbm %s1946_s21, 128  ;;  %s1561_s22 = scalar_lea.hbm %s1997_s7, 256 }
 0x4bf   : > { %p1558_p0 = scmp.ne.s32.totalorder %s1946_s21, %s1557_s15  ;;  %p1562_p8 = scmp.lt.u32.totalorder %s1946_s21, %s1997_s7 }
 0x4c0   : > { %p1563_p13 = scmp.lt.u32.totalorder %s1561_s22, %s1557_s15  ;;  %p1565_p10 = scmp.lt.u32.totalorder %s1557_s15, %s1946_s21 }
 0x4c1   : > { %p1559_p9 = pnand %p1558_p0, %p1816_p5 }
 0x4c2   : > { %p1564_p6 = por %p1563_p13, %p1562_p8 }
 0x4c3   : > { %p1560_p11 = pneg %p1559_p9 }
 0x4c4   : > { %p1566_p3 = por %p1565_p10, %p1564_p6 }
 0x4c6   : > { %p1567_p7 = pnand %p1566_p3, %p1560_p11 }
 0x4c8   : > { %1570 = shalt.err (!%p1567_p7)
}
 0x4c9   : > { %1331 = dma.vmem_to_hbm [thread:$0]  (%p1816_p5), %s1948_s29, 128, %s1946_s21, %s890_s16  }
 0x4ca PF: > { %s2017_s12 = sld [smem:[#allocation15_spill]]  ;;  %s915_s11 = sand.u32 1, %s1605_s24  }
 0x4cb   : > { %p2019_p2 = scmp.ge.s32.totalorder %s1617_s27, 2  ;;  %s916_s17 = scalar_lea.sflag [#allocation4], %s915_s11 }
 0x4d0   : > { %p2018_p12 = scmp.ne.s32.totalorder %s2017_s12, 0 }
 0x4d2   : > { %p1348_p1 = pnand %p2019_p2, %p2018_p12 }
 0x4d4   : > { %1600 = dma.done.wait (!%p1348_p1), %s916_s17, 128  }
 0x4d5   : > { %1602 = vsyncadd (!%p1348_p1), %s916_s17, 4294967168  ;;  %p22_p4 = scmp.ge.s32.totalorder %s1802_s8, 4   ;;  %s2020_s24 = smov %s1609_s25 }
 0x4d6   : > { %s2021_s25 = smov %s1613_s26  ;;  %s2022_s26 = smov %s1812_s19 }
 0x4d7   : > { %s2023_s27 = smov %s1802_s8  ;;  %24 = sbr.rel (!%p22_p4) target bundleno = 7 (0x7), region = 105 }
 0x4de   :  { %921 = vsyncpa [#allocation3], 1 }
 0x4df   :  { %923 = vsyncpa [#allocation3 + $0x1], 1 }
 0x4e0   :  { %924 = vsyncpa [#allocation6], 1 }
 0x4e1   :  { %925 = vsyncpa [#allocation9], 1 }
 0x4e2   :  { %926 = vsyncpa [#allocation4], 1 }
 0x4e3   :  { %928 = vsyncpa [#allocation4 + $0x1], 1 }

</bundles_post_ra>
